<compile_context>
chip_gen: v6e
topology: v6e:2x2x1
jax: 0.10.0
libtpu: 0.0.40
codegen_flags: <defaults>
</compile_context>

<pallas_src>
import functools

import jax
import jax.numpy as jnp
from jax.experimental import pallas as pl
from jax.experimental.pallas import tpu as pltpu


def _round_up(x, m):
    return ((x + m - 1) // m) * m


def _fused_heads_kernel(x_ref, wt_ref, b_ref, o_ref, *, compute_dtype):
    # x_ref: [TB, F] (features.dtype)   wt_ref: [F, TN] (compute_dtype)
    # b_ref: [1, TN] (f32)              o_ref:  [TB, TN] (features.dtype)
    x = x_ref[...].astype(compute_dtype)           # VPU cast, hidden under DMA/MXU
    acc = jnp.dot(x, wt_ref[...], preferred_element_type=jnp.float32)
    o_ref[...] = (acc + b_ref[...]).astype(o_ref.dtype)   # cast is free in the store


def fused_linear_heads(x, wt_cat, b_cat, *, batch_tile=1024, vmem_budget=48 << 20):
    """y = x @ wt_cat + b_cat in one batch-tiled (optionally class-tiled) Pallas call.

    x:      [B, F]       (any float dtype; cast to wt_cat.dtype in-kernel)
    wt_cat: [F, NC_pad]  pre-transposed, lane-padded to a multiple of 128
    b_cat:  [1, NC_pad]  float32
    returns [B, NC_pad] in x.dtype
    """
    B, F = x.shape
    F_w, NC_pad = wt_cat.shape
    assert F_w == F
    out_dtype = x.dtype
    compute_dtype = wt_cat.dtype

    x_bytes = jnp.dtype(x.dtype).itemsize
    w_bytes = jnp.dtype(wt_cat.dtype).itemsize
    o_bytes = jnp.dtype(out_dtype).itemsize

    # ---- class (lane) tile: keep W resident unless the slab is too big -----
    tn = NC_pad
    while F * tn * w_bytes > (24 << 20) and tn > 512:
        tn = _round_up(tn // 2, 128)
    grid_n = pl.cdiv(NC_pad, tn)
    resident_w = grid_n == 1
    n_w_buf = 1 if resident_w else 2

    # ---- batch (sublane) tile: sized from the VMEM budget ------------------
    w_foot = n_w_buf * (F * tn * w_bytes + 8 * tn * 4)     # weights + (sublane-padded) bias
    per_row = 2 * F * x_bytes + 2 * tn * o_bytes           # double-buffered x + out rows
    avail = max(vmem_budget - w_foot, per_row * 8)
    tb = max(8, (avail // per_row) // 8 * 8)
    tb = min(tb, _round_up(batch_tile, 8))
    # >= 2 steps on the "parallel" batch axis so both v7x TensorCores get work
    tb = min(tb, max(8, _round_up(pl.cdiv(B, 2), 8)))
    grid_m = pl.cdiv(B, tb)

    vmem_limit = int(1.5 * (w_foot + per_row * tb)) + (4 << 20)
    vmem_limit = min(max(vmem_limit, 32 << 20), 128 << 20)

    kernel = functools.partial(_fused_heads_kernel, compute_dtype=compute_dtype)

    def build(single_buffer_weights):
        wb_kwargs = (dict(pipeline_mode=pl.Buffered(1))
                     if single_buffer_weights else {})
        return pl.pallas_call(
            kernel,
            out_shape=jax.ShapeDtypeStruct((B, NC_pad), out_dtype),
            grid_spec=pltpu.PrefetchScalarGridSpec(
                num_scalar_prefetch=0,
                grid=(grid_m, grid_n),
                in_specs=[
                    pl.BlockSpec((tb, F), lambda i, j: (i, 0)),              # x (pipelined)
                    pl.BlockSpec((F, tn), lambda i, j: (0, j), **wb_kwargs),  # weights
                    pl.BlockSpec((1, tn), lambda i, j: (0, j), **wb_kwargs),  # bias
                ],
                out_specs=pl.BlockSpec((tb, tn), lambda i, j: (i, j)),
            ),
            compiler_params=pltpu.CompilerParams(
                dimension_semantics=("parallel", "parallel"),
                vmem_limit_bytes=vmem_limit,
            ),
        )

    if resident_w:
        try:
            return build(True)(x, wt_cat, b_cat)
        except Exception:
            pass  # pipeline_mode=Buffered(1) unsupported -> default double-buffering
    return build(False)(x, wt_cat, b_cat)


class ClassifierModulePallas:
    """JAX/Pallas port of the PyTorch ClassifierModule (fused linear heads)."""

    def __init__(self, out_features, architecture, key, param_dtype=jnp.float32):
        self.out_features = out_features
        self.architecture = list(architecture)
        self.param_dtype = param_dtype

        # Deterministic init mimicking nn.Linear default:
        # U(-1/sqrt(fan_in), 1/sqrt(fan_in)) for both weight and bias.
        bound = 1.0 / (out_features ** 0.5)
        ws, bs = [], []
        for nc in self.architecture:
            key, kw, kb = jax.random.split(key, 3)
            w = jax.random.uniform(kw, (nc, out_features), jnp.float32,
                                   minval=-bound, maxval=bound)
            b = jax.random.uniform(kb, (nc,), jnp.float32,
                                   minval=-bound, maxval=bound)
            ws.append(w)
            bs.append(b)
        # PyTorch-layout params kept for reference / export.
        self.params = list(zip(ws, bs))

        # Fused, pre-transposed, lane-padded parameters (built once at init).
        total_nc = sum(self.architecture)
        nc_pad = _round_up(max(total_nc, 1), 128)
        wt_cat = jnp.concatenate([w.T for w in ws], axis=1)          # [F, total_nc]
        b_cat = jnp.concatenate(bs, axis=0)                          # [total_nc]
        wt_cat = jnp.pad(wt_cat, ((0, 0), (0, nc_pad - total_nc)))
        b_cat = jnp.pad(b_cat, ((0, nc_pad - total_nc),))
        self.wt_cat = wt_cat.astype(param_dtype)                     # [F, NC_pad]
        self.b_cat = b_cat.reshape(1, nc_pad).astype(jnp.float32)    # [1, NC_pad]

        self._offsets = []
        off = 0
        for nc in self.architecture:
            self._offsets.append((off, nc))
            off += nc

    def __call__(self, features):
        # Single fused matmul over all heads; per-head views are cheap static
        # slices of the single fused output (kept out of the kernel so the
        # in-kernel store stays lane-dense).
        # TODO(synk): for very large feature dims, add K-tiling of the contraction.
        fused = fused_linear_heads(features, self.wt_cat, self.b_cat)
        return [fused[:, off:off + nc] for off, nc in self._offsets]


if __name__ == "__main__":
    key = jax.random.PRNGKey(0)
    key, kx, kp, kx2 = jax.random.split(key, 4)

    out_features = 32                 # feature dim coming into the classifiers
    architecture = [8, 16, 4]         # number of classes per classification head

    module = ClassifierModulePallas(out_features, architecture, kp)

    # 1) Tiny batch, f32 path: tight correctness check vs plain-JAX reference.
    feats = jax.random.normal(kx, (2, out_features), jnp.float32)
    outs = [jax.block_until_ready(o) for o in module(feats)]
    for (w, b), o, nc in zip(module.params, outs, architecture):
        ref = feats @ w.T + b
        assert o.shape == (2, nc)
        assert jnp.allclose(o, ref, atol=1e-5, rtol=1e-5)

    # 2) Ragged batch (13 rows, not a multiple of the 8-row batch tile):
    #    verifies that the cdiv grid + masked last block is correct.
    feats2 = jax.random.normal(kx2, (13, out_features), jnp.float32)
    outs2 = [jax.block_until_ready(o) for o in module(feats2)]
    for (w, b), o in zip(module.params, outs2):
        ref = feats2 @ w.T + b
        assert jnp.allclose(o, ref, atol=1e-5, rtol=1e-5)

    # 3) bf16 compute path (bf16 weights + in-kernel bf16 cast, f32 accumulate,
    #    f32 output) — loose tolerance, since logits are bf16-precision.
    module_bf16 = ClassifierModulePallas(out_features, architecture, kp,
                                         param_dtype=jnp.bfloat16)
    outs3 = [jax.block_until_ready(o) for o in module_bf16(feats)]
    for (w, b), o in zip(module_bf16.params, outs3):
        ref = feats @ w.T + b
        assert o.dtype == feats.dtype
        assert jnp.allclose(o, ref, atol=1e-1, rtol=1e-1)

    print("KERNEL_OK")
</pallas_src>

<mosaic_0001>
module attributes {stable_mosaic.version = 11 : i64} {
  func.func @_fused_heads_kernel(%arg0: i32, %arg1: i32, %arg2: memref<8x32xf32, #tpu.memory_space<vmem>>, %arg3: memref<32x128xf32, #tpu.memory_space<vmem>>, %arg4: memref<1x128xf32, #tpu.memory_space<vmem>>, %arg5: memref<8x128xf32, #tpu.memory_space<vmem>>) attributes {dimension_semantics = [#tpu.dimension_semantics<parallel>, #tpu.dimension_semantics<parallel>], iteration_bounds = array<i64: 1, 1>, scalar_prefetch = 0 : i64, scratch_operands = 0 : i64, tpu.core_type = #tpu.core_type<tc>, window_params = [{transform_indices = @transform_0, window_bounds = array<i64: 8, 32>}, {pipeline_mode = #tpu.pipeline_mode<synchronous>, transform_indices = @transform_1, window_bounds = array<i64: 32, 128>}, {pipeline_mode = #tpu.pipeline_mode<synchronous>, transform_indices = @transform_2, window_bounds = array<i64: 1, 128>}, {transform_indices = @transform_3, window_bounds = array<i64: 8, 128>}]} {
    %c0 = arith.constant 0 : index
    %c0_0 = arith.constant 0 : index
    %0 = vector.load %arg2[%c0, %c0_0] : memref<8x32xf32, #tpu.memory_space<vmem>>, vector<8x32xf32>
    %c0_1 = arith.constant 0 : index
    %c0_2 = arith.constant 0 : index
    %1 = vector.load %arg3[%c0_1, %c0_2] : memref<32x128xf32, #tpu.memory_space<vmem>>, vector<32x128xf32>
    %cst = arith.constant dense<0.000000e+00> : vector<8x128xf32>
    %2 = tpu.matmul %0, %1, %cst {dimension_numbers = #tpu.dot_dimension_numbers<[1], [0], [0], [1], [0, 0, 1, 1], [], []>} : vector<8x32xf32>, vector<32x128xf32>, vector<8x128xf32> -> vector<8x128xf32>
    %c0_3 = arith.constant 0 : index
    %c0_4 = arith.constant 0 : index
    %3 = vector.load %arg4[%c0_3, %c0_4] : memref<1x128xf32, #tpu.memory_space<vmem>>, vector<1x128xf32>
    %4 = vector.broadcast %3 : vector<1x128xf32> to vector<8x128xf32>
    %5 = arith.addf %2, %4 : vector<8x128xf32>
    %c0_5 = arith.constant 0 : index
    %c0_6 = arith.constant 0 : index
    %6 = vector.load %arg5[%c0_5, %c0_6] : memref<8x128xf32, #tpu.memory_space<vmem>>, vector<8x128xf32>
    tpu.vector_store %arg5[%c0_5, %c0_6], %5 {strides = array<i32>} : memref<8x128xf32, #tpu.memory_space<vmem>>, vector<8x128xf32>,
    return
  }
  func.func @transform_0(%arg0: i32, %arg1: i32) -> (i32, i32) {
    %c0_i32 = arith.constant 0 : i32
    %c0_i32_0 = arith.constant 0 : i32
    return %arg0, %c0_i32 : i32, i32
  }
  func.func @transform_1(%arg0: i32, %arg1: i32) -> (i32, i32) {
    %c0_i32 = arith.constant 0 : i32
    %c0_i32_0 = arith.constant 0 : i32
    return %c0_i32, %arg1 : i32, i32
  }
  func.func @transform_2(%arg0: i32, %arg1: i32) -> (i32, i32) {
    %c0_i32 = arith.constant 0 : i32
    %c0_i32_0 = arith.constant 0 : i32
    return %c0_i32, %arg1 : i32, i32
  }
  func.func @transform_3(%arg0: i32, %arg1: i32) -> (i32, i32) {
    %c0_i32 = arith.constant 0 : i32
    return %arg0, %arg1 : i32, i32
  }
}

module attributes {stable_mosaic.version = 11 : i64} {
  func.func @_fused_heads_kernel(%arg0: i32, %arg1: i32, %arg2: memref<8x32xf32, #tpu.memory_space<vmem>>, %arg3: memref<32x128xf32, #tpu.memory_space<vmem>>, %arg4: memref<1x128xf32, #tpu.memory_space<vmem>>, %arg5: memref<8x128xf32, #tpu.memory_space<vmem>>) attributes {dimension_semantics = [#tpu.dimension_semantics<parallel>, #tpu.dimension_semantics<parallel>], iteration_bounds = array<i64: 1, 1>, scalar_prefetch = 0 : i64, scratch_operands = 0 : i64, tpu.core_type = #tpu.core_type<tc>, window_params = [{transform_indices = @transform_0, window_bounds = array<i64: 8, 32>}, {transform_indices = @transform_1, window_bounds = array<i64: 32, 128>}, {transform_indices = @transform_2, window_bounds = array<i64: 1, 128>}, {transform_indices = @transform_3, window_bounds = array<i64: 8, 128>}]} {
    %c0 = arith.constant 0 : index
    %c0_0 = arith.constant 0 : index
    %0 = vector.load %arg2[%c0, %c0_0] : memref<8x32xf32, #tpu.memory_space<vmem>>, vector<8x32xf32>
    %c0_1 = arith.constant 0 : index
    %c0_2 = arith.constant 0 : index
    %1 = vector.load %arg3[%c0_1, %c0_2] : memref<32x128xf32, #tpu.memory_space<vmem>>, vector<32x128xf32>
    %cst = arith.constant dense<0.000000e+00> : vector<8x128xf32>
    %2 = tpu.matmul %0, %1, %cst {dimension_numbers = #tpu.dot_dimension_numbers<[1], [0], [0], [1], [0, 0, 1, 1], [], []>} : vector<8x32xf32>, vector<32x128xf32>, vector<8x128xf32> -> vector<8x128xf32>
    %c0_3 = arith.constant 0 : index
    %c0_4 = arith.constant 0 : index
    %3 = vector.load %arg4[%c0_3, %c0_4] : memref<1x128xf32, #tpu.memory_space<vmem>>, vector<1x128xf32>
    %4 = vector.broadcast %3 : vector<1x128xf32> to vector<8x128xf32>
    %5 = arith.addf %2, %4 : vector<8x128xf32>
    %c0_5 = arith.constant 0 : index
    %c0_6 = arith.constant 0 : index
    %6 = vector.load %arg5[%c0_5, %c0_6] : memref<8x128xf32, #tpu.memory_space<vmem>>, vector<8x128xf32>
    tpu.vector_store %arg5[%c0_5, %c0_6], %5 {strides = array<i32>} : memref<8x128xf32, #tpu.memory_space<vmem>>, vector<8x128xf32>,
    return
  }
  func.func @transform_0(%arg0: i32, %arg1: i32) -> (i32, i32) {
    %c0_i32 = arith.constant 0 : i32
    %c0_i32_0 = arith.constant 0 : i32
    return %arg0, %c0_i32 : i32, i32
  }
  func.func @transform_1(%arg0: i32, %arg1: i32) -> (i32, i32) {
    %c0_i32 = arith.constant 0 : i32
    %c0_i32_0 = arith.constant 0 : i32
    return %c0_i32, %arg1 : i32, i32
  }
  func.func @transform_2(%arg0: i32, %arg1: i32) -> (i32, i32) {
    %c0_i32 = arith.constant 0 : i32
    %c0_i32_0 = arith.constant 0 : i32
    return %c0_i32, %arg1 : i32, i32
  }
  func.func @transform_3(%arg0: i32, %arg1: i32) -> (i32, i32) {
    %c0_i32 = arith.constant 0 : i32
    return %arg0, %arg1 : i32, i32
  }
}

</mosaic_0001>

<bundles_post_ra>
// kernel: tpu_custom_call.1
= control target key start
LH: loop header
LB: loop body
LE: loop exit
PB: predicated region body
PF: predicated region fallthrough
CT: control target
= control target key end

     0   :  { %8 = vsyncpa [#allocation3], 0  ;;  %s288_s0 = inlined_call_operand.hbm [shape: f32[2,32], index: 0, kind: input, shape index: {}]   ;;  %s289_s1 = inlined_call_operand.hbm [shape: f32[32,128], index: 1, kind: input, shape index: {}]   ;;  %s290_s2 = inlined_call_operand.vmem [shape: f32[1,128], index: 2, kind: input, shape index: {}]   ;;  %s291_s3 = inlined_call_operand.hbm [shape: f32[2,128], index: 3, kind: output, shape index: {}]  }
   0x1   :  { %9 = vsyncpa [#allocation6], 0 }
   0x2   :  { %10 = vsyncpa [#allocation4], 0 }
   0x3   :  { %15 = vsyncadd [#allocation3], 96  ;;  %s241_s12 = smov [#allocation2]  }
   0x4   :  { %s16_s13 = sshll.u32 %s241_s12, 4  ;;  %s17_s13 = int_to_ptr.vmem [resolvable:$true] %s16_s13 }
   0x5   :  { %s183_s14 = scalar_lea.vmem %s17_s13, 32  ;;  %s187_s15 = scalar_lea.vmem %s17_s13, 128 }
   0x6   :  { %p184_p0 = scmp.ne.s32.totalorder %s17_s13, %s183_s14  ;;  %p188_p1 = scmp.lt.s32.totalorder %s17_s13, %s17_s13 }
   0x7   :  { %p189_p2 = scmp.lt.s32.totalorder %s187_s15, %s183_s14 }
   0x9   :  { %p190_p3 = por %p189_p2, %p188_p1 }
   0xb   :  { %p191_p4 = pnand %p190_p3, %p184_p0 }
   0xd   :  { %194 = shalt.err (!%p191_p4)
}
   0xe   :  { %s242_s16 = smov 32   ;;  %s243_s17 = smov 2  }
   0xf   :  { %22 = dma.hbm_to_vmem [thread:$0]  %s288_s0, 32, %s17_s13, [#allocation3], %s242_s16, %s242_s16, %s243_s17  }
  0x10   :  { %s244_s20 = smov [#allocation5]  }
  0x11   :  { %s28_s21 = sshll.u32 %s244_s20, 4  ;;  %s29_s21 = int_to_ptr.vmem [resolvable:$true] %s28_s21 }
  0x12   :  { %s203_s22 = scalar_lea.vmem %s29_s21, 512  ;;  %p208_p6 = scmp.lt.s32.totalorder %s29_s21, %s29_s21 }
  0x13   :  { %p204_p5 = scmp.ne.s32.totalorder %s29_s21, %s203_s22  ;;  %p209_p7 = scmp.lt.s32.totalorder %s203_s22, %s203_s22 }
  0x15   :  { %p210_p8 = por %p209_p7, %p208_p6 }
  0x17   :  { %p211_p9 = pnand %p210_p8, %p204_p5 }
  0x19   :  { %214 = shalt.err (!%p211_p9)
}
  0x1a   :  { %s245_s23 = smov 128   ;;  %s246_s24 = smov 8  }
  0x1b   :  { %34 = dma.hbm_to_vmem [thread:$0]  %s289_s1, 512, %s29_s21, [#allocation6], %s245_s23, %s245_s23, %s246_s24  }
  0x1c   :  { %235 = dma.done.wait [#allocation3], 128  }
  0x1d   :  { %236 = vsyncadd [#allocation3], 4294967168 }
  0x1e   :  { %237 = dma.done.wait [#allocation6], 512  }
  0x1f   :  { %238 = vsyncadd [#allocation6], 4294966784  ;;  %v247_v0 = vmov 0.0   ;;  %vm248_vm0 = vmmov 0   ;;  %v47_v1 = vld [vmem:[#allocation5 + $0x18] sm:$0xff]  ;;  %v46_v2 = vld [vmem:[#allocation5 + $0x10] sm:$0xff] }
  0x20   :  { %155 = vmatprep.subr.mxu0 %v247_v0  ;;  %163 = vmatprep.mubr.msk.f32.mxu0 %vm248_vm0, %v247_v0  ;;  %v45_v3 = vld [vmem:[#allocation5 + $0x8] sm:$0xff]  ;;  %v44_v4 = vld [vmem:[#allocation5] sm:$0xff]  ;;  %v43_v5 = vld [vmem:[#allocation2] sm:$0xff]  ;;  %vm55_vm1 = vcmask 261120  }
  0x21   :  { %156 = vmatpush3.msra.mxu0 %v47_v1  ;;  %v148_v6 = vld [vmem:[%s290_s2] ss:$0 sm:$0xff] }
  0x22   :  { %157 = vmatprep.subr.mxu0 %v247_v0 }
  0x23   :  { %158 = vmatpush3.msra.mxu0 %v46_v2 }
  0x24   :  { %159 = vmatprep.subr.mxu0 %v247_v0 }
  0x25   :  { %160 = vmatpush3.msra.mxu0 %v45_v3 }
  0x26   :  { %161 = vmatprep.subr.mxu0 %v247_v0 }
  0x27   :  { %162 = vmatpush3.msra.mxu0 %v44_v4 }
  0x28   :  { %164 = vmatmul.mubr.msk.f32.vlgmr.msra.gmra.mxu0 %vm55_vm1, %v43_v5 }
  0xe8   :  { %v125_v7 = vpop.f32.mrf.mxu0 }
  0xe9   :  { %v126_v8 = vadd.f32 %v148_v6, %v125_v7 }
  0xea   :  { %v165_v9 = vpop.f32.mrf.mxu0 }
  0xeb   :  { %129 = vst [vmem:[#allocation7] sm:$0xff] %v126_v8 }
  0xec   :  { %134 = vsyncadd [#allocation4], 96  ;;  %s249_s27 = smov [#allocation7]  }
  0xed   :  { %s135_s28 = sshll.u32 %s249_s27, 4  ;;  %s136_s28 = int_to_ptr.vmem [resolvable:$true] %s135_s28 }
  0xee   :  { %s215_s29 = scalar_lea.vmem %s136_s28, 32  ;;  %s219_s30 = scalar_lea.vmem %s136_s28, 128 }
  0xef   :  { %p216_p10 = scmp.ne.s32.totalorder %s136_s28, %s215_s29  ;;  %p220_p11 = scmp.lt.s32.totalorder %s136_s28, %s136_s28 }
  0xf0   :  { %p221_p12 = scmp.lt.s32.totalorder %s219_s30, %s215_s29 }
  0xf2   :  { %p222_p13 = por %p221_p12, %p220_p11 }
  0xf4   :  { %p223_p0 = pnand %p222_p13, %p216_p10 }
  0xf6   :  { %226 = shalt.err (!%p223_p0)
}
  0xf7   :  { %141 = dma.vmem_to_hbm [thread:$0]  %s136_s28, 32, %s291_s3, [#allocation4], %s242_s16, %s242_s16, %s243_s17  }
  0xf8   :  { %239 = dma.done.wait [#allocation4], 128  }
  0xf9   :  { %240 = vsyncadd [#allocation4], 4294967168 }
  0xfa   :  { %145 = vsyncpa [#allocation3], 1 }
  0xfb   :  { %146 = vsyncpa [#allocation6], 1 }
  0xfc   :  { %147 = vsyncpa [#allocation4], 1 }

// kernel: tpu_custom_call.1
= control target key start
LH: loop header
LB: loop body
LE: loop exit
PB: predicated region body
PF: predicated region fallthrough
CT: control target
= control target key end

     0   :  { %8 = vsyncpa [#allocation3], 0  ;;  %s288_s0 = inlined_call_operand.hbm [shape: f32[2,32], index: 0, kind: input, shape index: {}]   ;;  %s289_s1 = inlined_call_operand.hbm [shape: f32[32,128], index: 1, kind: input, shape index: {}]   ;;  %s290_s2 = inlined_call_operand.vmem [shape: f32[1,128], index: 2, kind: input, shape index: {}]   ;;  %s291_s3 = inlined_call_operand.hbm [shape: f32[2,128], index: 3, kind: output, shape index: {}]  }
   0x1   :  { %9 = vsyncpa [#allocation6], 0 }
   0x2   :  { %10 = vsyncpa [#allocation4], 0 }
   0x3   :  { %15 = vsyncadd [#allocation3], 96  ;;  %s241_s12 = smov [#allocation2]  }
   0x4   :  { %s16_s13 = sshll.u32 %s241_s12, 4  ;;  %s17_s13 = int_to_ptr.vmem [resolvable:$true] %s16_s13 }
   0x5   :  { %s183_s14 = scalar_lea.vmem %s17_s13, 32  ;;  %s187_s15 = scalar_lea.vmem %s17_s13, 128 }
   0x6   :  { %p184_p0 = scmp.ne.s32.totalorder %s17_s13, %s183_s14  ;;  %p188_p1 = scmp.lt.s32.totalorder %s17_s13, %s17_s13 }
   0x7   :  { %p189_p2 = scmp.lt.s32.totalorder %s187_s15, %s183_s14 }
   0x9   :  { %p190_p3 = por %p189_p2, %p188_p1 }
   0xb   :  { %p191_p4 = pnand %p190_p3, %p184_p0 }
   0xd   :  { %194 = shalt.err (!%p191_p4)
}
   0xe   :  { %s242_s16 = smov 32   ;;  %s243_s17 = smov 2  }
   0xf   :  { %22 = dma.hbm_to_vmem [thread:$0]  %s288_s0, 32, %s17_s13, [#allocation3], %s242_s16, %s242_s16, %s243_s17  }
  0x10   :  { %s244_s20 = smov [#allocation5]  }
  0x11   :  { %s28_s21 = sshll.u32 %s244_s20, 4  ;;  %s29_s21 = int_to_ptr.vmem [resolvable:$true] %s28_s21 }
  0x12   :  { %s203_s22 = scalar_lea.vmem %s29_s21, 512  ;;  %p208_p6 = scmp.lt.s32.totalorder %s29_s21, %s29_s21 }
  0x13   :  { %p204_p5 = scmp.ne.s32.totalorder %s29_s21, %s203_s22  ;;  %p209_p7 = scmp.lt.s32.totalorder %s203_s22, %s203_s22 }
  0x15   :  { %p210_p8 = por %p209_p7, %p208_p6 }
  0x17   :  { %p211_p9 = pnand %p210_p8, %p204_p5 }
  0x19   :  { %214 = shalt.err (!%p211_p9)
}
  0x1a   :  { %s245_s23 = smov 128   ;;  %s246_s24 = smov 8  }
  0x1b   :  { %34 = dma.hbm_to_vmem [thread:$0]  %s289_s1, 512, %s29_s21, [#allocation6], %s245_s23, %s245_s23, %s246_s24  }
  0x1c   :  { %235 = dma.done.wait [#allocation3], 128  }
  0x1d   :  { %236 = vsyncadd [#allocation3], 4294967168 }
  0x1e   :  { %237 = dma.done.wait [#allocation6], 512  }
  0x1f   :  { %238 = vsyncadd [#allocation6], 4294966784  ;;  %v247_v0 = vmov 0.0   ;;  %vm248_vm0 = vmmov 0   ;;  %v47_v1 = vld [vmem:[#allocation5 + $0x18] sm:$0xff]  ;;  %v46_v2 = vld [vmem:[#allocation5 + $0x10] sm:$0xff] }
  0x20   :  { %155 = vmatprep.subr.mxu0 %v247_v0  ;;  %163 = vmatprep.mubr.msk.f32.mxu0 %vm248_vm0, %v247_v0  ;;  %v45_v3 = vld [vmem:[#allocation5 + $0x8] sm:$0xff]  ;;  %v44_v4 = vld [vmem:[#allocation5] sm:$0xff]  ;;  %v43_v5 = vld [vmem:[#allocation2] sm:$0xff]  ;;  %vm55_vm1 = vcmask 261120  }
  0x21   :  { %156 = vmatpush3.msra.mxu0 %v47_v1  ;;  %v148_v6 = vld [vmem:[%s290_s2] ss:$0 sm:$0xff] }
  0x22   :  { %157 = vmatprep.subr.mxu0 %v247_v0 }
  0x23   :  { %158 = vmatpush3.msra.mxu0 %v46_v2 }
  0x24   :  { %159 = vmatprep.subr.mxu0 %v247_v0 }
  0x25   :  { %160 = vmatpush3.msra.mxu0 %v45_v3 }
  0x26   :  { %161 = vmatprep.subr.mxu0 %v247_v0 }
  0x27   :  { %162 = vmatpush3.msra.mxu0 %v44_v4 }
  0x28   :  { %164 = vmatmul.mubr.msk.f32.vlgmr.msra.gmra.mxu0 %vm55_vm1, %v43_v5 }
  0xe8   :  { %v125_v7 = vpop.f32.mrf.mxu0 }
  0xe9   :  { %v126_v8 = vadd.f32 %v148_v6, %v125_v7 }
  0xea   :  { %v165_v9 = vpop.f32.mrf.mxu0 }
  0xeb   :  { %129 = vst [vmem:[#allocation7] sm:$0xff] %v126_v8 }
  0xec   :  { %134 = vsyncadd [#allocation4], 96  ;;  %s249_s27 = smov [#allocation7]  }
  0xed   :  { %s135_s28 = sshll.u32 %s249_s27, 4  ;;  %s136_s28 = int_to_ptr.vmem [resolvable:$true] %s135_s28 }
  0xee   :  { %s215_s29 = scalar_lea.vmem %s136_s28, 32  ;;  %s219_s30 = scalar_lea.vmem %s136_s28, 128 }
  0xef   :  { %p216_p10 = scmp.ne.s32.totalorder %s136_s28, %s215_s29  ;;  %p220_p11 = scmp.lt.s32.totalorder %s136_s28, %s136_s28 }
  0xf0   :  { %p221_p12 = scmp.lt.s32.totalorder %s219_s30, %s215_s29 }
  0xf2   :  { %p222_p13 = por %p221_p12, %p220_p11 }
  0xf4   :  { %p223_p0 = pnand %p222_p13, %p216_p10 }
  0xf6   :  { %226 = shalt.err (!%p223_p0)
}
  0xf7   :  { %141 = dma.vmem_to_hbm [thread:$0]  %s136_s28, 32, %s291_s3, [#allocation4], %s242_s16, %s242_s16, %s243_s17  }
  0xf8   :  { %239 = dma.done.wait [#allocation4], 128  }
  0xf9   :  { %240 = vsyncadd [#allocation4], 4294967168 }
  0xfa   :  { %145 = vsyncpa [#allocation3], 1 }
  0xfb   :  { %146 = vsyncpa [#allocation6], 1 }
  0xfc   :  { %147 = vsyncpa [#allocation4], 1 }

</bundles_post_ra>
